<compile_context>
chip_gen: v5e
topology: v5e:2x2
jax: 0.10.0
libtpu: 0.0.40
codegen_flags: <defaults>
</compile_context>

<pallas_src>
import jax
import jax.numpy as jnp
import numpy as np
from jax.experimental import pallas as pl
from jax.experimental.pallas import tpu as pltpu


# ----------------------------------------------------------------------------
# Kernels
# ----------------------------------------------------------------------------

def _enc_proj_kernel(enc_ref, wh_t_ref, out_ref):
    """encoder_feature = encoder_outputs @ W_h^T  (bf16 MXU matmul, f32 acc)."""
    bb, t, d = enc_ref.shape
    enc2d = enc_ref[...].reshape(bb * t, d)                 # free relayout (t % 128 == 0)
    feat = jnp.dot(enc2d, wh_t_ref[...],
                   preferred_element_type=jnp.float32)      # (bb*t, d) f32
    out_ref[...] = feat.reshape(bb, t, d).astype(out_ref.dtype)


def _attention_kernel(enc_ref, ef_ref, dec_ref, mask_ref, cov_ref,
                      wc_row_ref, v_row_ref,
                      ct_ref, attn_ref, cov_out_ref):
    """Per-decoder-step attention: tanh energy, masked softmax, context, coverage."""
    enc = enc_ref[...].astype(jnp.float32)                  # (BB, T, D)
    ef = ef_ref[...].astype(jnp.float32)                    # (BB, T, D) precomputed W_h(enc)
    dec = dec_ref[...]                                      # (BB, D) f32 (decode_proj done in XLA)
    mask = mask_ref[...]                                    # (BB, T) f32
    cov = cov_ref[...]                                      # (BB, T) f32
    wc = wc_row_ref[...]                                    # (1, D) f32 (W_c column as a row)
    vr = v_row_ref[...]                                     # (1, D) f32

    # e = tanh(enc_feat + dec_fea + W_c * coverage), fused (no named big temps).
    # TODO(synk): strip-mine this chain over T sublane strips for very long T_pad.
    att_in = ef + dec[:, None, :] + cov[:, :, None] * wc[None, :, :]   # (BB, T, D)
    scores = jnp.sum(jnp.tanh(att_in) * vr[None, :, :], axis=-1)       # (BB, T) lane reduce

    # masked_fill(enc_padding_mask == 0, -1e9); padded T positions have mask == 0.
    scores = jnp.where(mask == 0.0, jnp.float32(-1000000000.0), scores)

    # softmax over T (lane axis); padded positions underflow to exactly 0.
    m = jnp.max(scores, axis=-1, keepdims=True)
    p = jnp.exp(scores - m)
    attn = p / jnp.sum(p, axis=-1, keepdims=True)                      # (BB, T)

    # c_t = bmm(attn, encoder_outputs): broadcast-multiply + sublane reduce.
    c_t = jnp.sum(enc * attn[:, :, None], axis=1)                      # (BB, D)

    ct_ref[...] = c_t.astype(ct_ref.dtype)
    attn_ref[...] = attn.astype(attn_ref.dtype)
    cov_out_ref[...] = (cov + attn).astype(cov_out_ref.dtype)


# ----------------------------------------------------------------------------
# Sizing helpers
# ----------------------------------------------------------------------------

def _vmem_limit_bytes():
    """~3/4 of per-core VMEM: 48 MiB on v7x, 96 MiB on v5e/v6e, 48 MiB fallback."""
    total = 64 * 1024 * 1024
    try:
        info = pltpu.get_tpu_info()
        total = int(getattr(info, "vmem_capacity_bytes", total))
    except Exception:
        pass
    return min(total * 3 // 4, 100 * 1024 * 1024)


def _pad_len(t):
    return max(128, pl.cdiv(t, 128) * 128)


def _pad_axis(x, axis, new_size, value=0.0):
    if x.shape[axis] == new_size:
        return x
    widths = [(0, 0)] * x.ndim
    widths[axis] = (0, new_size - x.shape[axis])
    return jnp.pad(x, widths, constant_values=value)


def _pick_block_b(b, t_pad, d, vmem_limit):
    """Batch block: T/D/dtype-aware VMEM fit, prefer >=2 even grid steps, sublane-dense."""
    bytes_per_row = (2 * (2 * t_pad * d * 2)     # enc + enc_feat, double-buffered bf16
                     + 3 * t_pad * d * 4         # live f32 temporaries in the fused chain
                     + 10 * t_pad * 4            # mask/cov/attn/scores vectors
                     + 8 * d * 4)                # dec_fea / c_t rows
    max_bb = max(1, int(vmem_limit * 0.7) // bytes_per_row)
    cands = [bb for bb in range(1, b + 1) if b % bb == 0 and bb <= max_bb] or [1]

    def score(bb):
        steps = b // bb
        return (steps >= 2,                  # >=2 steps: megacore can shard the grid
                bb % 8 == 0 or bb == b,      # sublane-dense blocks
                steps % 2 == 0,              # even step count balances 2 TensorCores
                bb)                          # then: biggest block (amortize per-step cost)

    return max(cands, key=score)


# ----------------------------------------------------------------------------
# Wrappers
# ----------------------------------------------------------------------------

def _enc_proj_padded(enc_p_bf16, W_h, vmem_limit, bb):
    """Run the projection kernel on the already T-padded bf16 encoder outputs."""
    b, t_pad, n = enc_p_bf16.shape
    wh_t = W_h.astype(jnp.bfloat16).T                      # (D, D), kernel does x @ W^T
    return pl.pallas_call(
        _enc_proj_kernel,
        out_shape=jax.ShapeDtypeStruct((b, t_pad, n), jnp.bfloat16),
        grid=(b // bb,),
        in_specs=[pl.BlockSpec((bb, t_pad, n), lambda i: (i, 0, 0)),
                  pl.BlockSpec((n, n), lambda i: (0, 0))],     # resident weight
        out_specs=pl.BlockSpec((bb, t_pad, n), lambda i: (i, 0, 0)),
        compiler_params=pltpu.CompilerParams(
            dimension_semantics=("parallel",),
            vmem_limit_bytes=vmem_limit),
    )(enc_p_bf16, wh_t)


def precompute_encoder_features(encoder_outputs, W_h):
    """W_h(encoder_outputs), computed ONCE per sequence (hoist out of the decode loop)."""
    b, t_k, n = encoder_outputs.shape
    vmem_limit = _vmem_limit_bytes()
    t_pad = _pad_len(t_k)
    enc_p = _pad_axis(encoder_outputs.astype(jnp.bfloat16), 1, t_pad)
    bb = _pick_block_b(b, t_pad, n, vmem_limit)
    ef_p = _enc_proj_padded(enc_p, W_h, vmem_limit, bb)
    return ef_p[:, :t_k, :]


def attention_forward(s_t_hat, encoder_outputs, enc_padding_mask, coverage,
                      params, encoder_feature=None):
    """Mirrors Attention.forward. Returns (c_t, attn_dist, coverage_new).

    Pass `encoder_feature=precompute_encoder_features(enc, W_h)` to hoist the
    W_h projection out of a decode loop; otherwise it is computed here.
    """
    b, t_k, n = encoder_outputs.shape
    f32, bf16 = jnp.float32, jnp.bfloat16

    vmem_limit = _vmem_limit_bytes()
    t_pad = _pad_len(t_k)
    bb = _pick_block_b(b, t_pad, n, vmem_limit)

    # bf16 streaming of the big (B, T, D) operands.
    enc_p = _pad_axis(encoder_outputs.astype(bf16), 1, t_pad)
    if encoder_feature is None:
        ef_p = _enc_proj_padded(enc_p, params["W_h"], vmem_limit, bb)
    else:
        ef_p = _pad_axis(encoder_feature.astype(bf16), 1, t_pad)

    # decode_proj(s_t_hat): tiny (B, D) matmul, left to XLA (pure latency on the MXU).
    dec_fea = (s_t_hat.astype(f32) @ params["W_dp"].astype(f32).T
               + params["b_dp"].astype(f32))

    mask_p = _pad_axis(enc_padding_mask.astype(f32), 1, t_pad)   # pad with 0 -> masked
    cov_p = _pad_axis(coverage.astype(f32), 1, t_pad)
    wc_row = params["W_c"].astype(f32).reshape(1, n)             # W_c weight (D,1) -> (1,D)
    v_row = params["v"].astype(f32).reshape(1, n)                # v weight (1,D)

    out_shape = (
        jax.ShapeDtypeStruct((b, n), f32),        # c_t
        jax.ShapeDtypeStruct((b, t_pad), f32),    # attn (lane-dense; cropped below)
        jax.ShapeDtypeStruct((b, t_pad), f32),    # coverage_new
    )
    in_specs = [
        pl.BlockSpec((bb, t_pad, n), lambda i: (i, 0, 0)),   # encoder_outputs (bf16)
        pl.BlockSpec((bb, t_pad, n), lambda i: (i, 0, 0)),   # encoder_feature (bf16)
        pl.BlockSpec((bb, n), lambda i: (i, 0)),             # dec_fea
        pl.BlockSpec((bb, t_pad), lambda i: (i, 0)),         # enc_padding_mask
        pl.BlockSpec((bb, t_pad), lambda i: (i, 0)),         # coverage
        pl.BlockSpec((1, n), lambda i: (0, 0)),              # W_c row (resident)
        pl.BlockSpec((1, n), lambda i: (0, 0)),              # v row   (resident)
    ]
    out_specs = (
        pl.BlockSpec((bb, n), lambda i: (i, 0)),
        pl.BlockSpec((bb, t_pad), lambda i: (i, 0)),
        pl.BlockSpec((bb, t_pad), lambda i: (i, 0)),
    )

    c_t, attn_p, cov_out_p = pl.pallas_call(
        _attention_kernel,
        out_shape=out_shape,
        grid=(b // bb,),
        in_specs=in_specs,
        out_specs=out_specs,
        compiler_params=pltpu.CompilerParams(
            dimension_semantics=("parallel",),
            vmem_limit_bytes=vmem_limit),
    )(enc_p, ef_p, dec_fea, mask_p, cov_p, wc_row, v_row)

    attn_dist = attn_p[:, :t_k].reshape(b, 1, t_k)    # attn_dist.unsqueeze(1)
    coverage_new = cov_out_p[:, :t_k]
    return c_t, attn_dist, coverage_new


# ----------------------------------------------------------------------------
# Plain-JAX reference (mirrors the PyTorch forward, full f32)
# ----------------------------------------------------------------------------

def attention_reference(s_t_hat, enc, mask, cov, params):
    W_h, W_c, v_w, W_dp, b_dp = (params["W_h"], params["W_c"], params["v"],
                                 params["W_dp"], params["b_dp"])
    enc_feat = enc @ W_h.T
    dec_fea = s_t_hat @ W_dp.T + b_dp
    att = enc_feat + dec_fea[:, None, :]
    cov_feat = cov[..., None] @ W_c.T
    e = jnp.tanh(att + cov_feat)
    scores = (e @ v_w.T)[..., 0]
    scores = jnp.where(mask == 0, -1000000000.0, scores)
    attn = jax.nn.softmax(scores, axis=1)
    c_t = jnp.einsum("bt,btn->bn", attn, enc)
    return c_t, attn[:, None, :], cov + attn


# ----------------------------------------------------------------------------
# Demo / correctness check
# ----------------------------------------------------------------------------

if __name__ == "__main__":
    # Small shapes: batch blocks of 8 (2 grid steps), T padded 16 -> 128 lanes,
    # D = 128 (lane-dense).
    B, T, D = 16, 16, 128
    key = jax.random.PRNGKey(0)
    ks = jax.random.split(key, 9)

    # Deterministic parameter init (synthetic; PyTorch weight layout (out, in)).
    params = {
        "W_h": jax.random.normal(ks[0], (D, D), jnp.float32) * 0.1,
        "W_c": jax.random.normal(ks[1], (D, 1), jnp.float32) * 0.1,
        "v": jax.random.normal(ks[2], (1, D), jnp.float32) * 0.1,
        "W_dp": jax.random.normal(ks[3], (D, D), jnp.float32) * 0.1,
        "b_dp": jax.random.normal(ks[4], (D,), jnp.float32) * 0.1,
    }

    s_t_hat = jax.random.normal(ks[5], (B, D), jnp.float32)
    encoder_outputs = jax.random.normal(ks[6], (B, T, D), jnp.float32)
    lengths = T - (jnp.arange(B) % 5)
    enc_padding_mask = (jnp.arange(T)[None, :] < lengths[:, None]).astype(jnp.float32)
    coverage = jax.random.uniform(ks[7], (B, T), jnp.float32)

    # Hoisted once-per-sequence projection (as it would be in a decode loop)...
    enc_feat = precompute_encoder_features(encoder_outputs, params["W_h"])
    # ...then the cheap per-decoder-step kernel.
    c_t, attn_dist, cov_new = attention_forward(
        s_t_hat, encoder_outputs, enc_padding_mask, coverage, params,
        encoder_feature=enc_feat)
    jax.block_until_ready((c_t, attn_dist, cov_new))

    c_t_r, attn_r, cov_r = attention_reference(
        s_t_hat, encoder_outputs, enc_padding_mask, coverage, params)

    # Tolerances account for bf16 streaming of encoder_outputs / encoder_feature
    # (the elementwise / softmax chain itself runs in f32).
    np.testing.assert_allclose(np.asarray(c_t), np.asarray(c_t_r),
                               atol=3e-2, rtol=2e-2)
    np.testing.assert_allclose(np.asarray(attn_dist), np.asarray(attn_r),
                               atol=1e-2, rtol=2e-2)
    np.testing.assert_allclose(np.asarray(cov_new), np.asarray(cov_r),
                               atol=1e-2, rtol=2e-2)

    print("KERNEL_OK")
</pallas_src>

<mosaic_0001>
module attributes {stable_mosaic.version = 11 : i64} {
  func.func @_enc_proj_kernel(%arg0: i32, %arg1: memref<8x128x128xbf16, #tpu.memory_space<vmem>>, %arg2: memref<128x128xbf16, #tpu.memory_space<vmem>>, %arg3: memref<8x128x128xbf16, #tpu.memory_space<vmem>>) attributes {dimension_semantics = [#tpu.dimension_semantics<parallel>], iteration_bounds = array<i64: 2>, scalar_prefetch = 0 : i64, scratch_operands = 0 : i64, tpu.core_type = #tpu.core_type<tc>, window_params = [{transform_indices = @transform_0, window_bounds = array<i64: 8, 128, 128>}, {pipeline_mode = #tpu.pipeline_mode<synchronous>, transform_indices = @transform_1, window_bounds = array<i64: 128, 128>}, {transform_indices = @transform_2, window_bounds = array<i64: 8, 128, 128>}]} {
    %c0 = arith.constant 0 : index
    %c0_0 = arith.constant 0 : index
    %c0_1 = arith.constant 0 : index
    %0 = vector.load %arg1[%c0, %c0_0, %c0_1] : memref<8x128x128xbf16, #tpu.memory_space<vmem>>, vector<8x128x128xbf16>
    %1 = vector.shape_cast %0 : vector<8x128x128xbf16> to vector<1024x128xbf16>
    %c0_2 = arith.constant 0 : index
    %c0_3 = arith.constant 0 : index
    %2 = vector.load %arg2[%c0_2, %c0_3] : memref<128x128xbf16, #tpu.memory_space<vmem>>, vector<128x128xbf16>
    %cst = arith.constant dense<0.000000e+00> : vector<1024x128xf32>
    %3 = tpu.matmul %1, %2, %cst {dimension_numbers = #tpu.dot_dimension_numbers<[1], [0], [0], [1], [0, 0, 1, 1], [], []>} : vector<1024x128xbf16>, vector<128x128xbf16>, vector<1024x128xf32> -> vector<1024x128xf32>
    %4 = vector.shape_cast %3 : vector<1024x128xf32> to vector<8x128x128xf32>
    %5 = arith.truncf %4 : vector<8x128x128xf32> to vector<8x128x128xbf16>
    %c0_4 = arith.constant 0 : index
    %c0_5 = arith.constant 0 : index
    %c0_6 = arith.constant 0 : index
    %6 = vector.load %arg3[%c0_4, %c0_5, %c0_6] : memref<8x128x128xbf16, #tpu.memory_space<vmem>>, vector<8x128x128xbf16>
    tpu.vector_store %arg3[%c0_4, %c0_5, %c0_6], %5 {strides = array<i32>} : memref<8x128x128xbf16, #tpu.memory_space<vmem>>, vector<8x128x128xbf16>,
    return
  }
  func.func @transform_0(%arg0: i32) -> (i32, i32, i32) {
    %c0_i32 = arith.constant 0 : i32
    %c0_i32_0 = arith.constant 0 : i32
    %c0_i32_1 = arith.constant 0 : i32
    return %arg0, %c0_i32, %c0_i32_0 : i32, i32, i32
  }
  func.func @transform_1(%arg0: i32) -> (i32, i32) {
    %c0_i32 = arith.constant 0 : i32
    %c0_i32_0 = arith.constant 0 : i32
    %c0_i32_1 = arith.constant 0 : i32
    return %c0_i32, %c0_i32_0 : i32, i32
  }
  func.func @transform_2(%arg0: i32) -> (i32, i32, i32) {
    %c0_i32 = arith.constant 0 : i32
    %c0_i32_0 = arith.constant 0 : i32
    %c0_i32_1 = arith.constant 0 : i32
    return %arg0, %c0_i32, %c0_i32_0 : i32, i32, i32
  }
}

</mosaic_0001>

<bundles_post_ra>
// kernel: tpu_custom_call.1
= control target key start
LH: loop header
LB: loop body
LE: loop exit
PB: predicated region body
PF: predicated region fallthrough
CT: control target
= control target key end

     0   :  { %7 = vsyncpa [#allocation3], 0  ;;  %s2728_s0 = inlined_call_operand.hbm [shape: bf16[16,128,128], index: 0, kind: input, shape index: {}]   ;;  %s2729_s1 = inlined_call_operand.hbm [shape: bf16[128,128], index: 1, kind: input, shape index: {}]   ;;  %s2730_s2 = inlined_call_operand.hbm [shape: bf16[16,128,128], index: 2, kind: output, shape index: {}]  }
   0x1   :  { %9 = vsyncpa [#allocation3 + $0x1], 0 }
   0x2   :  { %10 = vsyncpa [#allocation6], 0 }
   0x3   :  { %11 = vsyncpa [#allocation4], 0 }
   0x4   :  { %13 = vsyncpa [#allocation4 + $0x1], 0  ;;  %s2447_s9 = smov 0   ;;  %s2449_s10 = smov 0  }
   0x5   :  { %s2451_s11 = smov 0   ;;  %s2453_s12 = smov 0  }
   0x6 LB: > { %s2468_s13 = sadd.s32 4294967295, %s2425_s12   ;;  %s1445_s14 = sadd.s32 4294967294, %s2425_s12   ;;  %s2425_s12 = sphi %s2453_s12, %s2740_s12   ;;  %s2421_s11 = sphi %s2451_s11, %s2739_s11   ;;  %s2417_s10 = sphi %s2449_s10, %s2738_s10   ;;  %s2413_s9 = sphi %s2447_s9, %s2737_s9  }
   0x7   : > { %p39_p0 = scmp.ne.s32.totalorder %s2417_s10, %s2413_s9  ;;  %p40_p1 = scmp.eq.s32.totalorder %s2468_s13, 0 }
   0x8   : > { %p84_p2 = scmp.eq.s32.totalorder %s2468_s13, 1  ;;  %p90_p3 = scmp.eq.s32.totalorder %s1445_s14, 1 }
   0x9   : > { %p2477_p4 = por %p40_p1, %p39_p0  ;;  %p1446_p5 = scmp.ge.s32.totalorder %s2425_s12, 1 }
   0xa   : > { %p2482_p6 = por %p90_p3, %p39_p0  ;;  %p97_p7 = scmp.lt.s32.totalorder %s2425_s12, 3 }
   0xb   : > { %s108_s19 = sshll.u32 %s2729_s1, 4  ;;  %s2427_s21 = smov [#allocation5]   ;;  %s109_s19 = int_to_ptr.hbm [resolvable:$true] %s108_s19 }
   0xc   : > { %p2490_p8 = pnand %p1446_p5, %p97_p7  ;;  %s110_s22 = sshll.u32 %s2427_s21, 4  ;;  %s111_s22 = int_to_ptr.vmem [resolvable:$true] %s110_s22 }
   0xd   : > { %s2500_s23 = sadd.s32 1, %s2425_s12   ;;  %s2428_s24 = smov 64  }
   0xe   : > { %p2242_p9 = pneg %p2490_p8  ;;  %s2429_s25 = smov 4  }
   0xf   : > { %s23_s26 = ssub.s32 %s2425_s12, %s2500_s23  ;;  %s26_s27 = sadd.s32 1, %s2421_s11 }
  0x10   : > { %p2243_p10 = pnand %p2242_p9, %p40_p1  ;;  %p24_p12 = scmp.eq.s32.totalorder %s23_s26, 0 }
  0x11   : > { %p33_p13 = scmp.ne.s32.totalorder %s2421_s11, %s2417_s10  ;;  %p34_p0 = scmp.eq.s32.totalorder %s2425_s12, 0 }
  0x12   : > { %2245 = dma.hbm_to_vmem [thread:$0]  (!%p2243_p10), %s109_s19, 1024, %s111_s22, [#allocation6], %s2428_s24, %s2428_s24, %s2429_s25  }
  0x13   : > { %s2512_s28 = scalar_select %p24_p12, %s2421_s11, %s26_s27  }
  0x14   : > { %p2516_p3 = por %p84_p2, %p33_p13  ;;  %p2255_p5 = scmp.lt.s32.totalorder %s2425_s12, 2 }
  0x15   : > { %s124_s30 = sand.u32 1, %s2421_s11   ;;  %s1752_s3 = sshll.u32 %s2425_s12, 9 }
  0x16   : > { %p35_p7 = por %p34_p0, %p33_p13  ;;  %s1449_s4 = sshll.u32 %s124_s30, 9 }
  0x17   : > { %s134_s7 = scalar_lea.hbm %s2728_s0, %s1752_s3  ;;  %s128_s14 = scalar_lea.vmem [#allocation2], %s1449_s4 }
  0x18   : > { %s135_s8 = sshll.u32 %s134_s7, 4  ;;  %s137_s17 = sshll.u32 %s128_s14, 4  ;;  %s136_s8 = int_to_ptr.hbm [resolvable:$true] %s135_s8  ;;  %s138_s17 = int_to_ptr.vmem [resolvable:$true] %s137_s17 }
  0x19   : > { %p2526_p9 = pnand %p2255_p5, %p35_p7  ;;  %s125_s19 = scalar_lea.sflag [#allocation3], %s124_s30 }
  0x1a   : > { %s2325_s21 = sshra.s32 %s136_s8, 4  ;;  %s2332_s3 = scalar_lea.hbm %s2728_s0, 1024  ;;  %s2326_s21 = int_to_ptr.hbm [resolvable:$true] %s2325_s21 }
  0x1b   : > { %s2327_s22 = scalar_lea.hbm %s2326_s21, 512  ;;  %p2329_p10 = pneg %p2526_p9 }
  0x1c   : > { %p2328_p2 = scmp.ne.s32.totalorder %s2326_s21, %s2327_s22  ;;  %p2333_p0 = scmp.lt.s32.totalorder %s2326_s21, %s2728_s0 }
  0x1d   : > { %p2334_p5 = scmp.lt.s32.totalorder %s2332_s3, %s2327_s22 }
  0x1e   : > { %p2330_p12 = pnand %p2329_p10, %p2328_p2 }
  0x1f   : > { %p2335_p7 = por %p2334_p5, %p2333_p0 }
  0x20   : > { %p2331_p13 = pneg %p2330_p12 }
  0x22   : > { %p2336_p11 = pnand %p2335_p7, %p2331_p13 }
  0x24   : > { %2339 = shalt.err (!%p2336_p11)
}
  0x25   : > { %2249 = dma.hbm_to_vmem [thread:$0]  (!%p2526_p9), %s136_s8, 8192, %s138_s17, %s125_s19, %s2428_s24, %s2428_s24, %s2429_s25  }
  0x26   : > { %149 = sbr.rel (%p2490_p8) target bundleno = 466 (0x1d2), region = 28  ;;  %s2546_s30 = sand.u32 (!%p2490_p8), 1, %s2417_s10  }
  0x27   : > { %s1454_s6 = sshll.u32 (!%p2490_p8), %s2546_s30, 9  ;;  %s152_s7 = scalar_lea.sflag (!%p2490_p8), [#allocation3], %s2546_s30 }
  0x28   : > { %s2552_s14 = scalar_lea.vmem (!%p2490_p8), [#allocation2], %s1454_s6 }
  0x2b   : > { %2400 = dma.done.wait (%p2477_p4), %s152_s7, 8192  }
  0x2c   : > { %2402 = vsyncadd (%p2477_p4), %s152_s7, 4294959104 }
  0x2d   : > { %2404 = dma.done.wait (%p40_p1), [#allocation6], 1024  }
  0x2e   : > { %2406 = vsyncadd (%p40_p1), [#allocation6], 4294966272  ;;  %v1824_v0 = vld [vmem:[#allocation5 + $0x38] sm:$0xff]  ;;  %v1823_v1 = vld [vmem:[#allocation5 + $0x30] sm:$0xff]  ;;  %s2600_s15 = scalar_lea.vmem [#allocation7], %s1454_s6  ;;  %s1826_s20 = sshll.u32 %s2468_s13, 9 }
  0x2f   : > { %760 = vmatpush.bf16.msra.mxu0 %v1824_v0  ;;  %2210 = vmatpush.bf16.msra.mxu1 %v1824_v0  ;;  %v1822_v2 = vld [vmem:[#allocation5 + $0x28] sm:$0xff]  ;;  %v1821_v3 = vld [vmem:[#allocation5 + $0x20] sm:$0xff]  ;;  %v1820_v4 = vld [vmem:[#allocation5 + $0x18] sm:$0xff]  ;;  %s1358_s8 = scalar_lea.hbm %s2730_s2, %s1826_s20  ;;  %s1359_s17 = sshll.u32 %s2600_s15, 4  ;;  %s1360_s17 = int_to_ptr.vmem [resolvable:$true] %s1359_s17 }
  0x30   : > { %2211 = vmatpush.bf16.msra.mxu2 %v1824_v0  ;;  %2212 = vmatpush.bf16.msra.mxu3 %v1824_v0  ;;  %v1819_v5 = vld [vmem:[#allocation5 + $0x10] sm:$0xff]  ;;  %v1818_v6 = vld [vmem:[#allocation5 + $0x8] sm:$0xff]  ;;  %v1817_v7 = vld [vmem:[#allocation5] sm:$0xff]  ;;  %s1361_s18 = sshll.u32 %s1358_s8, 4  ;;  %s1346_s13 = scalar_lea.sflag [#allocation4], %s2546_s30  ;;  %s1362_s18 = int_to_ptr.hbm [resolvable:$true] %s1361_s18 }
  0x31   : > { %v1753_v8 = vld [vmem:[%s2552_s14] sm:$0xff]  ;;  %v1754_v12 = vld [vmem:[%s2552_s14 + $0x8] sm:$0xff]  ;;  %v1755_v16 = vld [vmem:[%s2552_s14 + $0x10] sm:$0xff]  ;;  %s2369_s19 = sshra.s32 %s1362_s18, 4  ;;  %s2375_s27 = scalar_lea.hbm %s2730_s2, 1024  ;;  %s2370_s19 = int_to_ptr.hbm [resolvable:$true] %s2369_s19 }
  0x32   : > { %v1769_v9 = vld [vmem:[%s2552_s14 + $0x80] sm:$0xff]  ;;  %v1770_v13 = vld [vmem:[%s2552_s14 + $0x88] sm:$0xff]  ;;  %v1771_v17 = vld [vmem:[%s2552_s14 + $0x90] sm:$0xff]  ;;  %s2371_s21 = scalar_lea.hbm %s2370_s19, 512  ;;  %p2376_p11 = scmp.lt.s32.totalorder %s2370_s19, %s2730_s2 }
  0x33   : > { %761 = vmatpush.bf16.msra.mxu0 %v1823_v1  ;;  %2213 = vmatpush.bf16.msra.mxu1 %v1823_v1  ;;  %v1785_v10 = vld [vmem:[%s2552_s14 + $0x100] sm:$0xff]  ;;  %v1786_v14 = vld [vmem:[%s2552_s14 + $0x108] sm:$0xff]  ;;  %v1787_v18 = vld [vmem:[%s2552_s14 + $0x110] sm:$0xff]  ;;  %p2372_p1 = scmp.ne.s32.totalorder %s2370_s19, %s2371_s21  ;;  %p2377_p9 = scmp.lt.s32.totalorder %s2375_s27, %s2371_s21 }
  0x34   : > { %2214 = vmatpush.bf16.msra.mxu2 %v1823_v1  ;;  %2215 = vmatpush.bf16.msra.mxu3 %v1823_v1  ;;  %v1801_v11 = vld [vmem:[%s2552_s14 + $0x180] sm:$0xff]  ;;  %v1802_v15 = vld [vmem:[%s2552_s14 + $0x188] sm:$0xff]  ;;  %v1803_v19 = vld [vmem:[%s2552_s14 + $0x190] sm:$0xff] }
  0x35   : > { %v1756_v20 = vld [vmem:[%s2552_s14 + $0x18] sm:$0xff]  ;;  %v1757_v24 = vld [vmem:[%s2552_s14 + $0x20] sm:$0xff]  ;;  %v1758_v28 = vld [vmem:[%s2552_s14 + $0x28] sm:$0xff]  ;;  %p2373_p4 = pnand %p2372_p1, %p2516_p3  ;;  %p2378_p2 = por %p2377_p9, %p2376_p11 }
  0x36   : > { %v1772_v21 = vld [vmem:[%s2552_s14 + $0x98] sm:$0xff]  ;;  %v1773_v25 = vld [vmem:[%s2552_s14 + $0xa0] sm:$0xff]  ;;  %v1774_v29 = vld [vmem:[%s2552_s14 + $0xa8] sm:$0xff] }
  0x37   : > { %762 = vmatpush.bf16.msra.mxu0 %v1822_v2  ;;  %2216 = vmatpush.bf16.msra.mxu1 %v1822_v2  ;;  %v1788_v22 = vld [vmem:[%s2552_s14 + $0x118] sm:$0xff]  ;;  %v1789_v26 = vld [vmem:[%s2552_s14 + $0x120] sm:$0xff]  ;;  %v1790_v30 = vld [vmem:[%s2552_s14 + $0x128] sm:$0xff]  ;;  %p2374_p8 = pneg %p2373_p4 }
  0x38   : > { %2217 = vmatpush.bf16.msra.mxu2 %v1822_v2  ;;  %2218 = vmatpush.bf16.msra.mxu3 %v1822_v2  ;;  %v1804_v23 = vld [vmem:[%s2552_s14 + $0x198] sm:$0xff]  ;;  %v1805_v27 = vld [vmem:[%s2552_s14 + $0x1a0] sm:$0xff]  ;;  %v1806_v31 = vld [vmem:[%s2552_s14 + $0x1a8] sm:$0xff] }
  0x39   : > { %v1759_v32 = vld [vmem:[%s2552_s14 + $0x30] sm:$0xff]  ;;  %v1760_v36 = vld [vmem:[%s2552_s14 + $0x38] sm:$0xff]  ;;  %v1761_v40 = vld [vmem:[%s2552_s14 + $0x40] sm:$0xff]  ;;  %p2379_p10 = pnand %p2378_p2, %p2374_p8 }
  0x3a   : > { %v1775_v33 = vld [vmem:[%s2552_s14 + $0xb0] sm:$0xff]  ;;  %v1776_v37 = vld [vmem:[%s2552_s14 + $0xb8] sm:$0xff]  ;;  %v1777_v41 = vld [vmem:[%s2552_s14 + $0xc0] sm:$0xff] }
  0x3b   : > { %763 = vmatpush.bf16.msra.mxu0 %v1821_v3  ;;  %2219 = vmatpush.bf16.msra.mxu1 %v1821_v3  ;;  %v1791_v34 = vld [vmem:[%s2552_s14 + $0x130] sm:$0xff]  ;;  %v1792_v38 = vld [vmem:[%s2552_s14 + $0x138] sm:$0xff]  ;;  %v1793_v44 = vld [vmem:[%s2552_s14 + $0x140] sm:$0xff] }
  0x3c   : > { %2220 = vmatpush.bf16.msra.mxu2 %v1821_v3  ;;  %2221 = vmatpush.bf16.msra.mxu3 %v1821_v3  ;;  %v1807_v35 = vld [vmem:[%s2552_s14 + $0x1b0] sm:$0xff]  ;;  %v1808_v39 = vld [vmem:[%s2552_s14 + $0x1b8] sm:$0xff]  ;;  %v1809_v45 = vld [vmem:[%s2552_s14 + $0x1c0] sm:$0xff] }
  0x3d   : > { %v1762_v54 = vld [vmem:[%s2552_s14 + $0x48] sm:$0xff] }
  0x3e   : > { %v1778_v55 = vld [vmem:[%s2552_s14 + $0xc8] sm:$0xff] }
  0x3f   : > { %764 = vmatpush.bf16.msra.mxu0 %v1820_v4  ;;  %2222 = vmatpush.bf16.msra.mxu1 %v1820_v4  ;;  %v1794_v60 = vld [vmem:[%s2552_s14 + $0x148] sm:$0xff] }
  0x40   : > { %2223 = vmatpush.bf16.msra.mxu2 %v1820_v4  ;;  %2224 = vmatpush.bf16.msra.mxu3 %v1820_v4  ;;  %v1810_v61 = vld [vmem:[%s2552_s14 + $0x1c8] sm:$0xff] }
  0x43   : > { %765 = vmatpush.bf16.msra.mxu0 %v1819_v5  ;;  %2225 = vmatpush.bf16.msra.mxu1 %v1819_v5 }
  0x44   : > { %2226 = vmatpush.bf16.msra.mxu2 %v1819_v5  ;;  %2227 = vmatpush.bf16.msra.mxu3 %v1819_v5 }
  0x47   : > { %766 = vmatpush.bf16.msra.mxu0 %v1818_v6  ;;  %2228 = vmatpush.bf16.msra.mxu1 %v1818_v6 }
  0x48   : > { %2229 = vmatpush.bf16.msra.mxu2 %v1818_v6  ;;  %2230 = vmatpush.bf16.msra.mxu3 %v1818_v6  ;;  %v1763_v6 = vld [vmem:[%s2552_s14 + $0x50] sm:$0xff] }
  0x4b   : > { %767 = vmatpush.bf16.msra.mxu0 %v1817_v7  ;;  %2231 = vmatpush.bf16.msra.mxu1 %v1817_v7 }
  0x4c   : > { %2232 = vmatpush.bf16.msra.mxu2 %v1817_v7  ;;  %2233 = vmatpush.bf16.msra.mxu3 %v1817_v7  ;;  %v1779_v7 = vld [vmem:[%s2552_s14 + $0xd0] sm:$0xff] }
  0x4e   : > { %768 = vmatmul.bf16.vlgmr.msra.gmra.mxu0 %v1753_v8  ;;  %848 = vmatmul.bf16.vlgmr.msra.gmra.mxu1 %v1769_v9 }
  0x4f   : > { %928 = vmatmul.bf16.vlgmr.msra.gmra.mxu2 %v1785_v10  ;;  %1008 = vmatmul.bf16.vlgmr.msra.gmra.mxu3 %v1801_v11 }
  0x5e   : > { %773 = vmatmul.bf16.gmra.mxu0 %v1754_v12  ;;  %853 = vmatmul.bf16.gmra.mxu1 %v1770_v13  ;;  %v1795_v12 = vld [vmem:[%s2552_s14 + $0x150] sm:$0xff] }
  0x5f   : > { %933 = vmatmul.bf16.gmra.mxu2 %v1786_v14  ;;  %1013 = vmatmul.bf16.gmra.mxu3 %v1802_v15  ;;  %v1811_v13 = vld [vmem:[%s2552_s14 + $0x1d0] sm:$0xff] }
  0x6e   : > { %778 = vmatmul.bf16.gmra.mxu0 %v1755_v16  ;;  %858 = vmatmul.bf16.gmra.mxu1 %v1771_v17 }
  0x6f   : > { %938 = vmatmul.bf16.gmra.mxu2 %v1787_v18  ;;  %1018 = vmatmul.bf16.gmra.mxu3 %v1803_v19 }
  0x7e   : > { %783 = vmatmul.bf16.gmra.mxu0 %v1756_v20  ;;  %863 = vmatmul.bf16.gmra.mxu1 %v1772_v21 }
  0x7f   : > { %943 = vmatmul.bf16.gmra.mxu2 %v1788_v22  ;;  %1023 = vmatmul.bf16.gmra.mxu3 %v1804_v23  ;;  %v1764_v22 = vld [vmem:[%s2552_s14 + $0x58] sm:$0xff] }
  0x80   : > { %v1780_v23 = vld [vmem:[%s2552_s14 + $0xd8] sm:$0xff] }
  0x8e   : > { %788 = vmatmul.bf16.gmra.mxu0 %v1757_v24  ;;  %868 = vmatmul.bf16.gmra.mxu1 %v1773_v25 }
  0x8f   : > { %948 = vmatmul.bf16.gmra.mxu2 %v1789_v26  ;;  %1028 = vmatmul.bf16.gmra.mxu3 %v1805_v27 }
  0x9e   : > { %793 = vmatmul.bf16.gmra.mxu0 %v1758_v28  ;;  %873 = vmatmul.bf16.gmra.mxu1 %v1774_v29  ;;  %v1796_v28 = vld [vmem:[%s2552_s14 + $0x158] sm:$0xff] }
  0x9f   : > { %953 = vmatmul.bf16.gmra.mxu2 %v1790_v30  ;;  %1033 = vmatmul.bf16.gmra.mxu3 %v1806_v31  ;;  %v1812_v29 = vld [vmem:[%s2552_s14 + $0x1d8] sm:$0xff] }
  0xae   : > { %798 = vmatmul.bf16.gmra.mxu0 %v1759_v32  ;;  %878 = vmatmul.bf16.gmra.mxu1 %v1775_v33 }
  0xaf   : > { %958 = vmatmul.bf16.gmra.mxu2 %v1791_v34  ;;  %1038 = vmatmul.bf16.gmra.mxu3 %v1807_v35 }
  0xbe   : > { %803 = vmatmul.bf16.gmra.mxu0 %v1760_v36  ;;  %883 = vmatmul.bf16.gmra.mxu1 %v1776_v37 }
  0xbf   : > { %963 = vmatmul.bf16.gmra.mxu2 %v1792_v38  ;;  %1043 = vmatmul.bf16.gmra.mxu3 %v1808_v39  ;;  %v1765_v38 = vld [vmem:[%s2552_s14 + $0x60] sm:$0xff] }
  0xc0   : > { %v1781_v39 = vld [vmem:[%s2552_s14 + $0xe0] sm:$0xff] }
  0xcb   : > { %v769_v42 = vpop.f32.mrf.mxu0  ;;  %v849_v43 = vpop.f32.mrf.mxu1 }
  0xce   : > { %808 = vmatmul.bf16.gmra.mxu0 %v1761_v40  ;;  %888 = vmatmul.bf16.gmra.mxu1 %v1777_v41 }
  0xcf   : > { %968 = vmatmul.bf16.gmra.mxu2 %v1793_v44  ;;  %1048 = vmatmul.bf16.gmra.mxu3 %v1809_v45  ;;  %v1797_v44 = vld [vmem:[%s2552_s14 + $0x160] sm:$0xff] }
  0xd0   : > { %v1813_v45 = vld [vmem:[%s2552_s14 + $0x1e0] sm:$0xff] }
  0xd2   : > { %v929_v46 = vpop.f32.mrf.mxu2  ;;  %v1009_v47 = vpop.f32.mrf.mxu3 }
  0xd3   : > { %v771_v48 = vpop.f32.mrf.mxu0  ;;  %v851_v49 = vpop.f32.mrf.mxu1 }
  0xd4   : > { %v1830_v50 = vpack.c.bf16 %v771_v48, %v769_v42  ;;  %v1910_v51 = vpack.c.bf16 %v851_v49, %v849_v43 }
  0xd6   : > { %1831 = vst [vmem:[%s2600_s15] sm:$0xff] %v1830_v50  }
  0xd7   : > { %2162 = vst [vmem:[%s2600_s15 + $0x80] sm:$0xff] %v1910_v51  }
  0xda   : > { %v931_v52 = vpop.f32.mrf.mxu2  ;;  %v1011_v53 = vpop.f32.mrf.mxu3 }
  0xdb   : > { %v1990_v56 = vpack.c.bf16 %v931_v52, %v929_v46  ;;  %v2070_v57 = vpack.c.bf16 %v1011_v53, %v1009_v47  ;;  %v774_v58 = vpop.f32.mrf.mxu0  ;;  %v854_v59 = vpop.f32.mrf.mxu1 }
  0xdd   : > { %2178 = vst [vmem:[%s2600_s15 + $0x100] sm:$0xff] %v1990_v56  }
  0xde   : > { %2194 = vst [vmem:[%s2600_s15 + $0x180] sm:$0xff] %v2070_v57   ;;  %813 = vmatmul.bf16.gmra.mxu0 %v1762_v54  ;;  %893 = vmatmul.bf16.gmra.mxu1 %v1778_v55  ;;  %v1766_v54 = vld [vmem:[%s2552_s14 + $0x68] sm:$0xff] }
  0xdf   : > { %973 = vmatmul.bf16.gmra.mxu2 %v1794_v60  ;;  %1053 = vmatmul.bf16.gmra.mxu3 %v1810_v61  ;;  %v1782_v55 = vld [vmem:[%s2552_s14 + $0xe8] sm:$0xff] }
  0xe0   : > { %v1798_v60 = vld [vmem:[%s2552_s14 + $0x168] sm:$0xff] }
  0xe1   : > { %v1814_v61 = vld [vmem:[%s2552_s14 + $0x1e8] sm:$0xff] }
  0xe2   : > { %v934_v62 = vpop.f32.mrf.mxu2  ;;  %v1014_v63 = vpop.f32.mrf.mxu3 }
  0xe3   : > { %v776_v0 = vpop.f32.mrf.mxu0  ;;  %v856_v1 = vpop.f32.mrf.mxu1 }
  0xe4   : > { %v1835_v2 = vpack.c.bf16 %v776_v0, %v774_v58  ;;  %v1915_v3 = vpack.c.bf16 %v856_v1, %v854_v59 }
  0xe6   : > { %2147 = vst [vmem:[%s2600_s15 + $0x8] sm:$0xff] %v1835_v2  }
  0xe7   : > { %2163 = vst [vmem:[%s2600_s15 + $0x88] sm:$0xff] %v1915_v3  }
  0xea   : > { %v936_v4 = vpop.f32.mrf.mxu2  ;;  %v1016_v5 = vpop.f32.mrf.mxu3 }
  0xeb   : > { %v1995_v8 = vpack.c.bf16 %v936_v4, %v934_v62  ;;  %v2075_v9 = vpack.c.bf16 %v1016_v5, %v1014_v63  ;;  %v779_v10 = vpop.f32.mrf.mxu0  ;;  %v859_v11 = vpop.f32.mrf.mxu1 }
  0xed   : > { %2179 = vst [vmem:[%s2600_s15 + $0x108] sm:$0xff] %v1995_v8  }
  0xee   : > { %2195 = vst [vmem:[%s2600_s15 + $0x188] sm:$0xff] %v2075_v9   ;;  %818 = vmatmul.bf16.gmra.mxu0 %v1763_v6  ;;  %898 = vmatmul.bf16.gmra.mxu1 %v1779_v7  ;;  %v1767_v6 = vld [vmem:[%s2552_s14 + $0x70] sm:$0xff] }
  0xef   : > { %978 = vmatmul.bf16.gmra.mxu2 %v1795_v12  ;;  %1058 = vmatmul.bf16.gmra.mxu3 %v1811_v13  ;;  %v1783_v7 = vld [vmem:[%s2552_s14 + $0xf0] sm:$0xff] }
  0xf0   : > { %v1799_v12 = vld [vmem:[%s2552_s14 + $0x170] sm:$0xff] }
  0xf1   : > { %v1815_v13 = vld [vmem:[%s2552_s14 + $0x1f0] sm:$0xff] }
  0xf2   : > { %v939_v14 = vpop.f32.mrf.mxu2  ;;  %v1019_v15 = vpop.f32.mrf.mxu3 }
  0xf3   : > { %v781_v16 = vpop.f32.mrf.mxu0  ;;  %v861_v17 = vpop.f32.mrf.mxu1 }
  0xf4   : > { %v1840_v18 = vpack.c.bf16 %v781_v16, %v779_v10  ;;  %v1920_v19 = vpack.c.bf16 %v861_v17, %v859_v11 }
  0xf6   : > { %2148 = vst [vmem:[%s2600_s15 + $0x10] sm:$0xff] %v1840_v18  }
  0xf7   : > { %2164 = vst [vmem:[%s2600_s15 + $0x90] sm:$0xff] %v1920_v19  }
  0xfa   : > { %v941_v20 = vpop.f32.mrf.mxu2  ;;  %v1021_v21 = vpop.f32.mrf.mxu3 }
  0xfb   : > { %v2000_v24 = vpack.c.bf16 %v941_v20, %v939_v14  ;;  %v2080_v25 = vpack.c.bf16 %v1021_v21, %v1019_v15  ;;  %v784_v26 = vpop.f32.mrf.mxu0  ;;  %v864_v27 = vpop.f32.mrf.mxu1 }
  0xfd   : > { %2180 = vst [vmem:[%s2600_s15 + $0x110] sm:$0xff] %v2000_v24  }
  0xfe   : > { %2196 = vst [vmem:[%s2600_s15 + $0x190] sm:$0xff] %v2080_v25   ;;  %823 = vmatmul.bf16.gmra.mxu0 %v1764_v22  ;;  %903 = vmatmul.bf16.gmra.mxu1 %v1780_v23  ;;  %v1768_v22 = vld [vmem:[%s2552_s14 + $0x78] sm:$0xff] }
  0xff   : > { %983 = vmatmul.bf16.gmra.mxu2 %v1796_v28  ;;  %1063 = vmatmul.bf16.gmra.mxu3 %v1812_v29  ;;  %v1784_v23 = vld [vmem:[%s2552_s14 + $0xf8] sm:$0xff] }
 0x100   : > { %v1800_v28 = vld [vmem:[%s2552_s14 + $0x178] sm:$0xff] }
 0x101   : > { %v1816_v29 = vld [vmem:[%s2552_s14 + $0x1f8] sm:$0xff] }
 0x102   : > { %v944_v30 = vpop.f32.mrf.mxu2  ;;  %v1024_v31 = vpop.f32.mrf.mxu3 }
 0x103   : > { %v786_v32 = vpop.f32.mrf.mxu0  ;;  %v866_v33 = vpop.f32.mrf.mxu1 }
 0x104   : > { %v1845_v34 = vpack.c.bf16 %v786_v32, %v784_v26  ;;  %v1925_v35 = vpack.c.bf16 %v866_v33, %v864_v27 }
 0x106   : > { %2149 = vst [vmem:[%s2600_s15 + $0x18] sm:$0xff] %v1845_v34  }
 0x107   : > { %2165 = vst [vmem:[%s2600_s15 + $0x98] sm:$0xff] %v1925_v35  }
 0x10a   : > { %v946_v36 = vpop.f32.mrf.mxu2  ;;  %v1026_v37 = vpop.f32.mrf.mxu3 }
 0x10b   : > { %v2005_v40 = vpack.c.bf16 %v946_v36, %v944_v30  ;;  %v2085_v41 = vpack.c.bf16 %v1026_v37, %v1024_v31  ;;  %v789_v42 = vpop.f32.mrf.mxu0  ;;  %v869_v43 = vpop.f32.mrf.mxu1 }
 0x10d   : > { %2181 = vst [vmem:[%s2600_s15 + $0x118] sm:$0xff] %v2005_v40  }
 0x10e   : > { %2197 = vst [vmem:[%s2600_s15 + $0x198] sm:$0xff] %v2085_v41   ;;  %828 = vmatmul.bf16.gmra.mxu0 %v1765_v38  ;;  %908 = vmatmul.bf16.gmra.mxu1 %v1781_v39 }
 0x10f   : > { %988 = vmatmul.bf16.gmra.mxu2 %v1797_v44  ;;  %1068 = vmatmul.bf16.gmra.mxu3 %v1813_v45 }
 0x112   : > { %v949_v46 = vpop.f32.mrf.mxu2  ;;  %v1029_v47 = vpop.f32.mrf.mxu3 }
 0x113   : > { %v791_v48 = vpop.f32.mrf.mxu0  ;;  %v871_v49 = vpop.f32.mrf.mxu1 }
 0x114   : > { %v1850_v50 = vpack.c.bf16 %v791_v48, %v789_v42  ;;  %v1930_v51 = vpack.c.bf16 %v871_v49, %v869_v43 }
 0x116   : > { %2150 = vst [vmem:[%s2600_s15 + $0x20] sm:$0xff] %v1850_v50  }
 0x117   : > { %2166 = vst [vmem:[%s2600_s15 + $0xa0] sm:$0xff] %v1930_v51  }
 0x11a   : > { %v951_v52 = vpop.f32.mrf.mxu2  ;;  %v1031_v53 = vpop.f32.mrf.mxu3 }
 0x11b   : > { %v2010_v56 = vpack.c.bf16 %v951_v52, %v949_v46  ;;  %v2090_v57 = vpack.c.bf16 %v1031_v53, %v1029_v47  ;;  %v794_v58 = vpop.f32.mrf.mxu0  ;;  %v874_v59 = vpop.f32.mrf.mxu1 }
 0x11d   : > { %2182 = vst [vmem:[%s2600_s15 + $0x120] sm:$0xff] %v2010_v56  }
 0x11e   : > { %2198 = vst [vmem:[%s2600_s15 + $0x1a0] sm:$0xff] %v2090_v57   ;;  %833 = vmatmul.bf16.gmra.mxu0 %v1766_v54  ;;  %913 = vmatmul.bf16.gmra.mxu1 %v1782_v55 }
 0x11f   : > { %993 = vmatmul.bf16.gmra.mxu2 %v1798_v60  ;;  %1073 = vmatmul.bf16.gmra.mxu3 %v1814_v61 }
 0x122   : > { %v954_v62 = vpop.f32.mrf.mxu2  ;;  %v1034_v63 = vpop.f32.mrf.mxu3 }
 0x123   : > { %v796_v0 = vpop.f32.mrf.mxu0  ;;  %v876_v1 = vpop.f32.mrf.mxu1 }
 0x124   : > { %v1855_v2 = vpack.c.bf16 %v796_v0, %v794_v58  ;;  %v1935_v3 = vpack.c.bf16 %v876_v1, %v874_v59 }
 0x126   : > { %2151 = vst [vmem:[%s2600_s15 + $0x28] sm:$0xff] %v1855_v2  }
 0x127   : > { %2167 = vst [vmem:[%s2600_s15 + $0xa8] sm:$0xff] %v1935_v3  }
 0x12a   : > { %v956_v4 = vpop.f32.mrf.mxu2  ;;  %v1036_v5 = vpop.f32.mrf.mxu3 }
 0x12b   : > { %v2015_v8 = vpack.c.bf16 %v956_v4, %v954_v62  ;;  %v2095_v9 = vpack.c.bf16 %v1036_v5, %v1034_v63  ;;  %v799_v10 = vpop.f32.mrf.mxu0  ;;  %v879_v11 = vpop.f32.mrf.mxu1 }
 0x12d   : > { %2183 = vst [vmem:[%s2600_s15 + $0x128] sm:$0xff] %v2015_v8  }
 0x12e   : > { %2199 = vst [vmem:[%s2600_s15 + $0x1a8] sm:$0xff] %v2095_v9   ;;  %838 = vmatmul.bf16.gmra.mxu0 %v1767_v6  ;;  %918 = vmatmul.bf16.gmra.mxu1 %v1783_v7 }
 0x12f   : > { %998 = vmatmul.bf16.gmra.mxu2 %v1799_v12  ;;  %1078 = vmatmul.bf16.gmra.mxu3 %v1815_v13 }
 0x132   : > { %v959_v14 = vpop.f32.mrf.mxu2  ;;  %v1039_v15 = vpop.f32.mrf.mxu3 }
 0x133   : > { %v801_v16 = vpop.f32.mrf.mxu0  ;;  %v881_v17 = vpop.f32.mrf.mxu1 }
 0x134   : > { %v1860_v18 = vpack.c.bf16 %v801_v16, %v799_v10  ;;  %v1940_v19 = vpack.c.bf16 %v881_v17, %v879_v11 }
 0x136   : > { %2152 = vst [vmem:[%s2600_s15 + $0x30] sm:$0xff] %v1860_v18  }
 0x137   : > { %2168 = vst [vmem:[%s2600_s15 + $0xb0] sm:$0xff] %v1940_v19  }
 0x13a   : > { %v961_v20 = vpop.f32.mrf.mxu2  ;;  %v1041_v21 = vpop.f32.mrf.mxu3 }
 0x13b   : > { %v2020_v24 = vpack.c.bf16 %v961_v20, %v959_v14  ;;  %v2100_v25 = vpack.c.bf16 %v1041_v21, %v1039_v15  ;;  %v804_v26 = vpop.f32.mrf.mxu0  ;;  %v884_v27 = vpop.f32.mrf.mxu1 }
 0x13d   : > { %2184 = vst [vmem:[%s2600_s15 + $0x130] sm:$0xff] %v2020_v24  }
 0x13e   : > { %2200 = vst [vmem:[%s2600_s15 + $0x1b0] sm:$0xff] %v2100_v25   ;;  %843 = vmatmul.bf16.gmra.mxu0 %v1768_v22  ;;  %923 = vmatmul.bf16.gmra.mxu1 %v1784_v23 }
 0x13f   : > { %1003 = vmatmul.bf16.gmra.mxu2 %v1800_v28  ;;  %1083 = vmatmul.bf16.gmra.mxu3 %v1816_v29 }
 0x142   : > { %v964_v30 = vpop.f32.mrf.mxu2  ;;  %v1044_v31 = vpop.f32.mrf.mxu3 }
 0x143   : > { %v806_v32 = vpop.f32.mrf.mxu0  ;;  %v886_v33 = vpop.f32.mrf.mxu1 }
 0x144   : > { %v1865_v34 = vpack.c.bf16 %v806_v32, %v804_v26  ;;  %v1945_v35 = vpack.c.bf16 %v886_v33, %v884_v27 }
 0x146   : > { %2153 = vst [vmem:[%s2600_s15 + $0x38] sm:$0xff] %v1865_v34  }
 0x147   : > { %2169 = vst [vmem:[%s2600_s15 + $0xb8] sm:$0xff] %v1945_v35  }
 0x14a   : > { %v966_v36 = vpop.f32.mrf.mxu2  ;;  %v1046_v37 = vpop.f32.mrf.mxu3 }
 0x14b   : > { %v2025_v38 = vpack.c.bf16 %v966_v36, %v964_v30  ;;  %v2105_v39 = vpack.c.bf16 %v1046_v37, %v1044_v31  ;;  %v809_v40 = vpop.f32.mrf.mxu0  ;;  %v889_v41 = vpop.f32.mrf.mxu1 }
 0x14d   : > { %2185 = vst [vmem:[%s2600_s15 + $0x138] sm:$0xff] %v2025_v38  }
 0x14e   : > { %2201 = vst [vmem:[%s2600_s15 + $0x1b8] sm:$0xff] %v2105_v39  }
 0x152   : > { %v969_v42 = vpop.f32.mrf.mxu2  ;;  %v1049_v43 = vpop.f32.mrf.mxu3 }
 0x153   : > { %v811_v44 = vpop.f32.mrf.mxu0  ;;  %v891_v45 = vpop.f32.mrf.mxu1 }
 0x154   : > { %v1870_v46 = vpack.c.bf16 %v811_v44, %v809_v40  ;;  %v1950_v47 = vpack.c.bf16 %v891_v45, %v889_v41 }
 0x156   : > { %2154 = vst [vmem:[%s2600_s15 + $0x40] sm:$0xff] %v1870_v46  }
 0x157   : > { %2170 = vst [vmem:[%s2600_s15 + $0xc0] sm:$0xff] %v1950_v47  }
 0x15a   : > { %v971_v48 = vpop.f32.mrf.mxu2  ;;  %v1051_v49 = vpop.f32.mrf.mxu3 }
 0x15b   : > { %v2030_v50 = vpack.c.bf16 %v971_v48, %v969_v42  ;;  %v2110_v51 = vpack.c.bf16 %v1051_v49, %v1049_v43  ;;  %v814_v52 = vpop.f32.mrf.mxu0  ;;  %v894_v53 = vpop.f32.mrf.mxu1 }
 0x15d   : > { %2186 = vst [vmem:[%s2600_s15 + $0x140] sm:$0xff] %v2030_v50  }
 0x15e   : > { %2202 = vst [vmem:[%s2600_s15 + $0x1c0] sm:$0xff] %v2110_v51  }
 0x162   : > { %v974_v54 = vpop.f32.mrf.mxu2  ;;  %v1054_v55 = vpop.f32.mrf.mxu3 }
 0x163   : > { %v816_v56 = vpop.f32.mrf.mxu0  ;;  %v896_v57 = vpop.f32.mrf.mxu1 }
 0x164   : > { %v1875_v58 = vpack.c.bf16 %v816_v56, %v814_v52  ;;  %v1955_v59 = vpack.c.bf16 %v896_v57, %v894_v53 }
 0x166   : > { %2155 = vst [vmem:[%s2600_s15 + $0x48] sm:$0xff] %v1875_v58  }
 0x167   : > { %2171 = vst [vmem:[%s2600_s15 + $0xc8] sm:$0xff] %v1955_v59  }
 0x16a   : > { %v976_v60 = vpop.f32.mrf.mxu2  ;;  %v1056_v61 = vpop.f32.mrf.mxu3 }
 0x16b   : > { %v2035_v62 = vpack.c.bf16 %v976_v60, %v974_v54  ;;  %v2115_v63 = vpack.c.bf16 %v1056_v61, %v1054_v55  ;;  %v819_v0 = vpop.f32.mrf.mxu0  ;;  %v899_v1 = vpop.f32.mrf.mxu1 }
 0x16d   : > { %2187 = vst [vmem:[%s2600_s15 + $0x148] sm:$0xff] %v2035_v62  }
 0x16e   : > { %2203 = vst [vmem:[%s2600_s15 + $0x1c8] sm:$0xff] %v2115_v63  }
 0x172   : > { %v979_v2 = vpop.f32.mrf.mxu2  ;;  %v1059_v3 = vpop.f32.mrf.mxu3 }
 0x173   : > { %v821_v4 = vpop.f32.mrf.mxu0  ;;  %v901_v5 = vpop.f32.mrf.mxu1 }
 0x174   : > { %v1880_v6 = vpack.c.bf16 %v821_v4, %v819_v0  ;;  %v1960_v7 = vpack.c.bf16 %v901_v5, %v899_v1 }
 0x176   : > { %2156 = vst [vmem:[%s2600_s15 + $0x50] sm:$0xff] %v1880_v6  }
 0x177   : > { %2172 = vst [vmem:[%s2600_s15 + $0xd0] sm:$0xff] %v1960_v7  }
 0x17a   : > { %v981_v8 = vpop.f32.mrf.mxu2  ;;  %v1061_v9 = vpop.f32.mrf.mxu3 }
 0x17b   : > { %v2040_v10 = vpack.c.bf16 %v981_v8, %v979_v2  ;;  %v2120_v11 = vpack.c.bf16 %v1061_v9, %v1059_v3  ;;  %v824_v12 = vpop.f32.mrf.mxu0  ;;  %v904_v13 = vpop.f32.mrf.mxu1 }
 0x17d   : > { %2188 = vst [vmem:[%s2600_s15 + $0x150] sm:$0xff] %v2040_v10  }
 0x17e   : > { %2204 = vst [vmem:[%s2600_s15 + $0x1d0] sm:$0xff] %v2120_v11  }
 0x182   : > { %v984_v14 = vpop.f32.mrf.mxu2  ;;  %v1064_v15 = vpop.f32.mrf.mxu3 }
 0x183   : > { %v826_v16 = vpop.f32.mrf.mxu0  ;;  %v906_v17 = vpop.f32.mrf.mxu1 }
 0x184   : > { %v1885_v18 = vpack.c.bf16 %v826_v16, %v824_v12  ;;  %v1965_v19 = vpack.c.bf16 %v906_v17, %v904_v13 }
 0x186   : > { %2157 = vst [vmem:[%s2600_s15 + $0x58] sm:$0xff] %v1885_v18  }
 0x187   : > { %2173 = vst [vmem:[%s2600_s15 + $0xd8] sm:$0xff] %v1965_v19  }
 0x18a   : > { %v986_v20 = vpop.f32.mrf.mxu2  ;;  %v1066_v21 = vpop.f32.mrf.mxu3 }
 0x18b   : > { %v2045_v22 = vpack.c.bf16 %v986_v20, %v984_v14  ;;  %v2125_v23 = vpack.c.bf16 %v1066_v21, %v1064_v15  ;;  %v829_v24 = vpop.f32.mrf.mxu0  ;;  %v909_v25 = vpop.f32.mrf.mxu1 }
 0x18d   : > { %2189 = vst [vmem:[%s2600_s15 + $0x158] sm:$0xff] %v2045_v22  }
 0x18e   : > { %2205 = vst [vmem:[%s2600_s15 + $0x1d8] sm:$0xff] %v2125_v23  }
 0x192   : > { %v989_v26 = vpop.f32.mrf.mxu2  ;;  %v1069_v27 = vpop.f32.mrf.mxu3 }
 0x193   : > { %v831_v28 = vpop.f32.mrf.mxu0  ;;  %v911_v29 = vpop.f32.mrf.mxu1 }
 0x194   : > { %v1890_v30 = vpack.c.bf16 %v831_v28, %v829_v24  ;;  %v1970_v31 = vpack.c.bf16 %v911_v29, %v909_v25 }
 0x196   : > { %2158 = vst [vmem:[%s2600_s15 + $0x60] sm:$0xff] %v1890_v30  }
 0x197   : > { %2174 = vst [vmem:[%s2600_s15 + $0xe0] sm:$0xff] %v1970_v31  }
 0x19a   : > { %v991_v32 = vpop.f32.mrf.mxu2  ;;  %v1071_v33 = vpop.f32.mrf.mxu3 }
 0x19b   : > { %v2050_v34 = vpack.c.bf16 %v991_v32, %v989_v26  ;;  %v2130_v35 = vpack.c.bf16 %v1071_v33, %v1069_v27  ;;  %v834_v36 = vpop.f32.mrf.mxu0  ;;  %v914_v37 = vpop.f32.mrf.mxu1 }
 0x19d   : > { %2190 = vst [vmem:[%s2600_s15 + $0x160] sm:$0xff] %v2050_v34  }
 0x19e   : > { %2206 = vst [vmem:[%s2600_s15 + $0x1e0] sm:$0xff] %v2130_v35  }
 0x1a2   : > { %v994_v38 = vpop.f32.mrf.mxu2  ;;  %v1074_v39 = vpop.f32.mrf.mxu3 }
 0x1a3   : > { %v836_v40 = vpop.f32.mrf.mxu0  ;;  %v916_v41 = vpop.f32.mrf.mxu1 }
 0x1a4   : > { %v1895_v42 = vpack.c.bf16 %v836_v40, %v834_v36  ;;  %v1975_v43 = vpack.c.bf16 %v916_v41, %v914_v37 }
 0x1a6   : > { %2159 = vst [vmem:[%s2600_s15 + $0x68] sm:$0xff] %v1895_v42  }
 0x1a7   : > { %2175 = vst [vmem:[%s2600_s15 + $0xe8] sm:$0xff] %v1975_v43  }
 0x1aa   : > { %v996_v44 = vpop.f32.mrf.mxu2  ;;  %v1076_v45 = vpop.f32.mrf.mxu3 }
 0x1ab   : > { %v2055_v46 = vpack.c.bf16 %v996_v44, %v994_v38  ;;  %v2135_v47 = vpack.c.bf16 %v1076_v45, %v1074_v39  ;;  %v839_v48 = vpop.f32.mrf.mxu0  ;;  %v919_v49 = vpop.f32.mrf.mxu1 }
 0x1ad   : > { %2191 = vst [vmem:[%s2600_s15 + $0x168] sm:$0xff] %v2055_v46  }
 0x1ae   : > { %2207 = vst [vmem:[%s2600_s15 + $0x1e8] sm:$0xff] %v2135_v47  }
 0x1b2   : > { %v999_v50 = vpop.f32.mrf.mxu2  ;;  %v1079_v51 = vpop.f32.mrf.mxu3 }
 0x1b3   : > { %v841_v52 = vpop.f32.mrf.mxu0  ;;  %v921_v53 = vpop.f32.mrf.mxu1 }
 0x1b4   : > { %v1900_v54 = vpack.c.bf16 %v841_v52, %v839_v48  ;;  %v1980_v55 = vpack.c.bf16 %v921_v53, %v919_v49 }
 0x1b6   : > { %2160 = vst [vmem:[%s2600_s15 + $0x70] sm:$0xff] %v1900_v54  }
 0x1b7   : > { %2176 = vst [vmem:[%s2600_s15 + $0xf0] sm:$0xff] %v1980_v55  }
 0x1ba   : > { %v1001_v56 = vpop.f32.mrf.mxu2  ;;  %v1081_v57 = vpop.f32.mrf.mxu3 }
 0x1bb   : > { %v2060_v58 = vpack.c.bf16 %v1001_v56, %v999_v50  ;;  %v2140_v59 = vpack.c.bf16 %v1081_v57, %v1079_v51  ;;  %v844_v60 = vpop.f32.mrf.mxu0  ;;  %v924_v61 = vpop.f32.mrf.mxu1 }
 0x1bd   : > { %2192 = vst [vmem:[%s2600_s15 + $0x170] sm:$0xff] %v2060_v58  }
 0x1be   : > { %2208 = vst [vmem:[%s2600_s15 + $0x1f0] sm:$0xff] %v2140_v59  }
 0x1c2   : > { %v1004_v62 = vpop.f32.mrf.mxu2  ;;  %v1084_v63 = vpop.f32.mrf.mxu3 }
 0x1c3   : > { %v846_v0 = vpop.f32.mrf.mxu0  ;;  %v926_v1 = vpop.f32.mrf.mxu1 }
 0x1c4   : > { %v1905_v2 = vpack.c.bf16 %v846_v0, %v844_v60  ;;  %v1985_v3 = vpack.c.bf16 %v926_v1, %v924_v61 }
 0x1c6   : > { %2161 = vst [vmem:[%s2600_s15 + $0x78] sm:$0xff] %v1905_v2  }
 0x1c7   : > { %2177 = vst [vmem:[%s2600_s15 + $0xf8] sm:$0xff] %v1985_v3  }
 0x1ca   : > { %v1006_v4 = vpop.f32.mrf.mxu2  ;;  %v1086_v5 = vpop.f32.mrf.mxu3 }
 0x1cb   : > { %v2065_v6 = vpack.c.bf16 %v1006_v4, %v1004_v62  ;;  %v2145_v7 = vpack.c.bf16 %v1086_v5, %v1084_v63 }
 0x1cd   : > { %2193 = vst [vmem:[%s2600_s15 + $0x178] sm:$0xff] %v2065_v6  }
 0x1ce   : > { %2209 = vst [vmem:[%s2600_s15 + $0x1f8] sm:$0xff] %v2145_v7  }
 0x1cf   : > { %2382 = shalt.err (!%p2379_p10)
}
 0x1d0   : > { %s2430_s5 = smov 64   ;;  %s2431_s30 = smov 4  }
 0x1d1   : > { %2240 = dma.vmem_to_hbm [thread:$0]  (%p2516_p3), %s1360_s17, 8192, %s1362_s18, %s1346_s13, %s2430_s5, %s2430_s5, %s2431_s30  }
 0x1d2 PF: > { %s1376_s6 = sand.u32 1, %s2413_s9   ;;  %p2736_p12 = scmp.ge.s32.totalorder %s2425_s12, 2 }
 0x1d3   : > { %s1377_s7 = scalar_lea.sflag [#allocation4], %s1376_s6 }
 0x1d4   : > { %p2251_p13 = pnand %p2736_p12, %p2482_p6 }
 0x1d6   : > { %p2252_p0 = pneg %p2251_p13 }
 0x1d8   : > { %2408 = dma.done.wait (%p2252_p0), %s1377_s7, 8192  }
 0x1d9   : > { %2410 = vsyncadd (%p2252_p0), %s1377_s7, 4294959104  ;;  %p16_p5 = scmp.ge.s32.totalorder %s2500_s23, 4   ;;  %s2737_s9 = smov %s2417_s10 }
 0x1da   : > { %s2738_s10 = smov %s2421_s11  ;;  %s2739_s11 = smov %s2512_s28 }
 0x1db   : > { %s2740_s12 = smov %s2500_s23  ;;  %18 = sbr.rel (!%p16_p5) target bundleno = 6 (0x6), region = 77 }
 0x1e0   :  { %1383 = vsyncpa [#allocation3], 1 }
 0x1e1   :  { %1385 = vsyncpa [#allocation3 + $0x1], 1 }
 0x1e2   :  { %1386 = vsyncpa [#allocation6], 1 }
 0x1e3   :  { %1387 = vsyncpa [#allocation4], 1 }
 0x1e4   :  { %1389 = vsyncpa [#allocation4 + $0x1], 1 }

</bundles_post_ra>
